<compile_context>
chip_gen: v7x
topology: tpu7x:2x2x1
jax: 0.10.0
libtpu: 0.0.40
codegen_flags: <defaults>
</compile_context>

<pallas_src>
import jax
import jax.numpy as jnp
from jax.experimental import pallas as pl
from jax.experimental.pallas import tpu as pltpu


# ---------------------------------------------------------------------------
# Kernels
# ---------------------------------------------------------------------------

def _bd_kernel_single_k(x_ref, w_ref, b_ref, o_ref):
    # x_ref: (tm, IN) f32    w_ref: (IN, tn) bf16/f32 (resident across i sweep)
    # b_ref: (1, tn) f32     o_ref: (tm, tn)
    x = x_ref[...].astype(w_ref.dtype)  # in-kernel cast; VPU under MXU slack
    acc = jnp.dot(x, w_ref[...], preferred_element_type=jnp.float32)
    o_ref[...] = (acc + b_ref[...]).astype(o_ref.dtype)


def _bd_kernel_ksplit(x_ref, w_ref, b_ref, o_ref, acc_ref):
    # Grid (i, j, k); acc_ref persists across the K (reduction, last) axis.
    k = pl.program_id(2)

    @pl.when(k == 0)
    def _():
        # Initialize accumulator with the broadcast bias -> no epilogue add.
        acc_ref[...] = jnp.broadcast_to(b_ref[...], acc_ref.shape)

    x = x_ref[...].astype(w_ref.dtype)
    acc_ref[...] += jnp.dot(x, w_ref[...], preferred_element_type=jnp.float32)

    @pl.when(k == pl.num_programs(2) - 1)
    def _():
        o_ref[...] = acc_ref[...].astype(o_ref.dtype)


# ---------------------------------------------------------------------------
# Tile selection
# ---------------------------------------------------------------------------

def _pick_tile(dim, max_tile, align, allow_partial):
    """Full extent if small; else largest `align`-multiple <= max_tile dividing
    `dim` exactly. If none exists: partial (cdiv) blocks for M/N axes, or full
    extent for the K axis (partial K tiles would read undefined padding into
    the reduction)."""
    if dim <= max_tile:
        return dim
    t = (max_tile // align) * align
    while t >= align:
        if dim % t == 0:
            return t
        t -= align
    if allow_partial:
        return (max_tile // align) * align
    # TODO(synk): for huge non-128-divisible IN, pad K once at param-prep time
    # instead of falling back to a full-extent K slab.
    return dim


# ---------------------------------------------------------------------------
# One-time parameter preparation (hoisted out of the per-call path)
# ---------------------------------------------------------------------------

def prepare_block_diagonal_params(w_stacked, b_stacked, *, use_bf16_matmul=True):
    """w_stacked: (NB, IN, BO) pre-transposed block weights; b_stacked: (NB, BO).
    Returns fused (IN, NB*BO) weight (optionally bf16) and (1, NB*BO) f32 bias.
    NOTE: bf16 MXU operands change numerics vs PyTorch's f32 nn.Linear; pass
    use_bf16_matmul=False for exact f32 semantics."""
    nb, in_f, bo = w_stacked.shape
    w_full = jnp.transpose(w_stacked, (1, 0, 2)).reshape(in_f, nb * bo)
    if use_bf16_matmul:
        w_full = w_full.astype(jnp.bfloat16)
    b_full = b_stacked.reshape(1, nb * bo).astype(jnp.float32)
    return w_full, b_full


# ---------------------------------------------------------------------------
# Forward
# ---------------------------------------------------------------------------

_K_MAX = 1024  # IN above this switches to the K-reduction grid
_VMEM_LIMIT = 48 * 1024 * 1024  # headroom on v5e/v6e; under v7x's 64 MiB physical


def block_diagonal(x, w_full, b_full):
    """x: (B, IN) f32; w_full: (IN, OUT) bf16/f32; b_full: (1, OUT) f32
    -> y: (B, OUT) in x.dtype."""
    B, IN = x.shape
    IN_w, OUT = w_full.shape
    assert IN_w == IN
    out_dtype = x.dtype
    out_bytes = B * OUT * jnp.dtype(out_dtype).itemsize
    x_bytes = x.size * jnp.dtype(x.dtype).itemsize
    w_bytes = w_full.size * jnp.dtype(w_full.dtype).itemsize

    if IN <= _K_MAX:
        # ---- single-K path: W slab resident across the whole row (i) sweep ----
        tm = _pick_tile(B, 512, 16, True)
        tn = _pick_tile(OUT, 1024, 128, True)
        nj, ni = pl.cdiv(OUT, tn), pl.cdiv(B, tm)
        grid = (nj, ni)  # inner axis = i -> W block index constant over it

        cost = pl.CostEstimate(
            flops=2 * B * IN * OUT,
            transcendentals=0,
            bytes_accessed=x_bytes * nj + w_bytes + b_full.size * 4 + out_bytes)

        return pl.pallas_call(
            _bd_kernel_single_k,
            out_shape=jax.ShapeDtypeStruct((B, OUT), out_dtype),
            grid_spec=pltpu.PrefetchScalarGridSpec(
                num_scalar_prefetch=0,
                grid=grid,
                in_specs=[
                    pl.BlockSpec((tm, IN), lambda j, i: (i, 0)),  # x row tile
                    pl.BlockSpec((IN, tn), lambda j, i: (0, j)),  # W: i-invariant
                    pl.BlockSpec((1, tn), lambda j, i: (0, j)),   # bias
                ],
                out_specs=pl.BlockSpec((tm, tn), lambda j, i: (i, j)),
            ),
            compiler_params=pltpu.CompilerParams(
                dimension_semantics=("parallel", "parallel"),
                vmem_limit_bytes=_VMEM_LIMIT),
            cost_estimate=cost,
        )(x, w_full, b_full)

    # ---- K-split path (large IN): accumulator over the reduction axis ----
    tm = _pick_tile(B, 512, 16, True)     # larger tm amortizes repeated W stream
    tn = _pick_tile(OUT, 1024, 128, True)
    tk = _pick_tile(IN, _K_MAX, 128, False)
    ni, nj, nk = pl.cdiv(B, tm), pl.cdiv(OUT, tn), pl.cdiv(IN, tk)
    grid = (ni, nj, nk)

    cost = pl.CostEstimate(
        flops=2 * B * IN * OUT,
        transcendentals=0,
        bytes_accessed=x_bytes * nj + w_bytes * ni + b_full.size * 4 + out_bytes)

    return pl.pallas_call(
        _bd_kernel_ksplit,
        out_shape=jax.ShapeDtypeStruct((B, OUT), out_dtype),
        grid_spec=pltpu.PrefetchScalarGridSpec(
            num_scalar_prefetch=0,
            grid=grid,
            in_specs=[
                pl.BlockSpec((tm, tk), lambda i, j, k: (i, k)),
                pl.BlockSpec((tk, tn), lambda i, j, k: (k, j)),
                pl.BlockSpec((1, tn), lambda i, j, k: (0, j)),
            ],
            out_specs=pl.BlockSpec((tm, tn), lambda i, j, k: (i, j)),
            scratch_shapes=[pltpu.VMEM((tm, tn), jnp.float32)],
        ),
        compiler_params=pltpu.CompilerParams(
            dimension_semantics=("parallel", "parallel", "arbitrary"),
            vmem_limit_bytes=_VMEM_LIMIT),
        cost_estimate=cost,
    )(x, w_full, b_full)


# ---------------------------------------------------------------------------
# Test
# ---------------------------------------------------------------------------

if __name__ == "__main__":
    # Module config (small; consistent with the docstring example).
    batch = 32
    in_features = 64
    out_features = 128
    num_blocks = 4
    block_out = out_features // num_blocks

    key = jax.random.PRNGKey(0)
    kx, kw, kb = jax.random.split(key, 3)

    # Deterministic param init (PyTorch Linear-style uniform bound),
    # stored already transposed: (num_blocks, in_features, block_out).
    bound = 1.0 / (in_features ** 0.5)
    w_stacked = jax.random.uniform(
        kw, (num_blocks, in_features, block_out),
        minval=-bound, maxval=bound, dtype=jnp.float32)
    b_stacked = jax.random.uniform(
        kb, (num_blocks, block_out),
        minval=-bound, maxval=bound, dtype=jnp.float32)
    x = jax.random.normal(kx, (batch, in_features), dtype=jnp.float32)

    bd = jax.jit(block_diagonal)

    # bf16-MXU path (default): fused weight built & cast ONCE at setup.
    w_bf16, b_full = prepare_block_diagonal_params(
        w_stacked, b_stacked, use_bf16_matmul=True)
    y = jax.block_until_ready(bd(x, w_bf16, b_full))
    assert y.shape == (batch, out_features)

    # Reference 1: same bf16-operand / f32-accumulate math as the kernel path.
    w_full_f32 = jnp.transpose(w_stacked, (1, 0, 2)).reshape(in_features, out_features)
    y_ref_bf16 = jnp.dot(x.astype(jnp.bfloat16), w_full_f32.astype(jnp.bfloat16),
                         preferred_element_type=jnp.float32) + b_stacked.reshape(1, -1)
    assert jnp.allclose(y.astype(jnp.float32), y_ref_bf16, atol=5e-3, rtol=5e-3), \
        "mismatch vs bf16-path reference"

    # Reference 2: full-f32 module semantics  concat_j (x @ W_j + b_j).
    y_ref_f32 = jnp.concatenate(
        [x @ w_stacked[j] + b_stacked[j] for j in range(num_blocks)], axis=-1)
    assert jnp.allclose(y.astype(jnp.float32), y_ref_f32, atol=3e-2, rtol=3e-2), \
        "mismatch vs f32 module reference (bf16 path)"

    # f32 path: exact PyTorch nn.Linear numerics.
    w_f32, b_full32 = prepare_block_diagonal_params(
        w_stacked, b_stacked, use_bf16_matmul=False)
    y32 = jax.block_until_ready(bd(x, w_f32, b_full32))
    assert jnp.allclose(y32, y_ref_f32, atol=1e-5, rtol=1e-5), \
        "mismatch vs f32 module reference (f32 path)"

    print("KERNEL_OK")
</pallas_src>

<mosaic_0001>
module attributes {stable_mosaic.version = 11 : i64} {
  func.func @_bd_kernel_single_k(%arg0: i32, %arg1: i32, %arg2: memref<32x64xf32, #tpu.memory_space<vmem>>, %arg3: memref<64x128xbf16, #tpu.memory_space<vmem>>, %arg4: memref<1x128xf32, #tpu.memory_space<vmem>>, %arg5: memref<32x128xf32, #tpu.memory_space<vmem>>) attributes {dimension_semantics = [#tpu.dimension_semantics<parallel>, #tpu.dimension_semantics<parallel>], iteration_bounds = array<i64: 1, 1>, scalar_prefetch = 0 : i64, scratch_operands = 0 : i64, tpu.core_type = #tpu.core_type<tc>, window_params = [{transform_indices = @transform_0, window_bounds = array<i64: 32, 64>}, {transform_indices = @transform_1, window_bounds = array<i64: 64, 128>}, {transform_indices = @transform_2, window_bounds = array<i64: 1, 128>}, {transform_indices = @transform_3, window_bounds = array<i64: 32, 128>}]} {
    %c0 = arith.constant 0 : index
    %c0_0 = arith.constant 0 : index
    %0 = vector.load %arg2[%c0, %c0_0] : memref<32x64xf32, #tpu.memory_space<vmem>>, vector<32x64xf32>
    %1 = arith.truncf %0 : vector<32x64xf32> to vector<32x64xbf16>
    %c0_1 = arith.constant 0 : index
    %c0_2 = arith.constant 0 : index
    %2 = vector.load %arg3[%c0_1, %c0_2] : memref<64x128xbf16, #tpu.memory_space<vmem>>, vector<64x128xbf16>
    %cst = arith.constant dense<0.000000e+00> : vector<32x128xf32>
    %3 = tpu.matmul %1, %2, %cst {dimension_numbers = #tpu.dot_dimension_numbers<[1], [0], [0], [1], [0, 0, 1, 1], [], []>} : vector<32x64xbf16>, vector<64x128xbf16>, vector<32x128xf32> -> vector<32x128xf32>
    %c0_3 = arith.constant 0 : index
    %c0_4 = arith.constant 0 : index
    %4 = vector.load %arg4[%c0_3, %c0_4] : memref<1x128xf32, #tpu.memory_space<vmem>>, vector<1x128xf32>
    %5 = vector.broadcast %4 : vector<1x128xf32> to vector<32x128xf32>
    %6 = arith.addf %3, %5 : vector<32x128xf32>
    %c0_5 = arith.constant 0 : index
    %c0_6 = arith.constant 0 : index
    %7 = vector.load %arg5[%c0_5, %c0_6] : memref<32x128xf32, #tpu.memory_space<vmem>>, vector<32x128xf32>
    tpu.vector_store %arg5[%c0_5, %c0_6], %6 {strides = array<i32>} : memref<32x128xf32, #tpu.memory_space<vmem>>, vector<32x128xf32>,
    return
  }
  func.func @transform_0(%arg0: i32, %arg1: i32) -> (i32, i32) {
    %c0_i32 = arith.constant 0 : i32
    %c0_i32_0 = arith.constant 0 : i32
    return %arg1, %c0_i32 : i32, i32
  }
  func.func @transform_1(%arg0: i32, %arg1: i32) -> (i32, i32) {
    %c0_i32 = arith.constant 0 : i32
    %c0_i32_0 = arith.constant 0 : i32
    return %c0_i32, %arg0 : i32, i32
  }
  func.func @transform_2(%arg0: i32, %arg1: i32) -> (i32, i32) {
    %c0_i32 = arith.constant 0 : i32
    %c0_i32_0 = arith.constant 0 : i32
    return %c0_i32, %arg0 : i32, i32
  }
  func.func @transform_3(%arg0: i32, %arg1: i32) -> (i32, i32) {
    %c0_i32 = arith.constant 0 : i32
    return %arg1, %arg0 : i32, i32
  }
}

</mosaic_0001>

<bundles_post_ra>
// kernel: block_diagonal.1
= control target key start
LH: loop header
LB: loop body
LE: loop exit
PB: predicated region body
PF: predicated region fallthrough
CT: control target
= control target key end

     0   :  { %8 = vsyncpa [#allocation3], 0  ;;  %s347_s0 = inlined_call_operand.hbm [shape: f32[32,64], index: 0, kind: input, shape index: {}]   ;;  %s348_s1 = inlined_call_operand.hbm [shape: bf16[64,128], index: 1, kind: input, shape index: {}]   ;;  %s349_s2 = inlined_call_operand.vmem [shape: f32[1,128], index: 2, kind: input, shape index: {}]   ;;  %s350_s3 = inlined_call_operand.hbm [shape: f32[32,128], index: 3, kind: output, shape index: {}]  }
   0x1   :  { %9 = vsyncpa [#allocation6], 0 }
   0x2   :  { %10 = vsyncpa [#allocation4], 0  ;;  %s275_s12 = smov [#allocation2]   ;;  %s203_s16 = scalar_lea.hbm %s347_s0, 512 }
   0x3   :  { %s16_s13 = sshll.u32 %s275_s12, 4  ;;  %p204_p0 = scmp.ne.s32.totalorder %s347_s0, %s203_s16  ;;  %s17_s13 = int_to_ptr.vmem [resolvable:$true] %s16_s13 }
   0x4   :  { %p207_p1 = scmp.lt.u32.totalorder %s203_s16, %s347_s0 }
   0x6   :  { %p209_p2 = pnand %p207_p1, %p204_p0 }
   0x8   :  { %212 = shalt.err (!%p209_p2)
}
   0x9   :  { %s213_s21 = scalar_lea.vmem %s17_s13, 512  ;;  %p218_p4 = scmp.lt.s32.totalorder %s17_s13, %s17_s13 }
   0xa   :  { %p214_p3 = scmp.ne.s32.totalorder %s17_s13, %s213_s21  ;;  %p219_p5 = scmp.lt.s32.totalorder %s213_s21, %s213_s21 }
   0xc   :  { %p220_p6 = por %p219_p5, %p218_p4 }
   0xe   :  { %p221_p7 = pnand %p220_p6, %p214_p3 }
  0x10   :  { %224 = shalt.err (!%p221_p7)
}
  0x11   :  { %s276_s22 = smov 128   ;;  %s277_s23 = smov 8  }
  0x12   :  { %22 = dma.hbm_to_vmem [thread:$0]  %s347_s0, 512, %s17_s13, [#allocation3], %s276_s22, %s276_s22, %s277_s23  }
  0x13   :  { %s278_s26 = smov [#allocation5]   ;;  %s225_s30 = scalar_lea.hbm %s348_s1, 512 }
  0x14   :  { %s28_s27 = sshll.u32 %s278_s26, 4  ;;  %p226_p8 = scmp.ne.s32.totalorder %s348_s1, %s225_s30  ;;  %s29_s27 = int_to_ptr.vmem [resolvable:$true] %s28_s27 }
  0x15   :  { %p229_p9 = scmp.lt.u32.totalorder %s225_s30, %s348_s1 }
  0x17   :  { %p231_p10 = pnand %p229_p9, %p226_p8 }
  0x19   :  { %234 = shalt.err (!%p231_p10)
}
  0x1a   :  { %s235_s8 = scalar_lea.vmem %s29_s27, 512  ;;  %p240_p12 = scmp.lt.s32.totalorder %s29_s27, %s29_s27 }
  0x1b   :  { %p236_p11 = scmp.ne.s32.totalorder %s29_s27, %s235_s8  ;;  %p241_p13 = scmp.lt.s32.totalorder %s235_s8, %s235_s8 }
  0x1d   :  { %p242_p0 = por %p241_p13, %p240_p12 }
  0x1f   :  { %p243_p1 = pnand %p242_p0, %p236_p11 }
  0x21   :  { %246 = shalt.err (!%p243_p1)
}
  0x22   :  { %s279_s0 = smov 64   ;;  %s280_s9 = smov 4  }
  0x23   :  { %34 = dma.hbm_to_vmem [thread:$0]  %s348_s1, 512, %s29_s27, [#allocation6], %s279_s0, %s279_s0, %s280_s9  }
  0x24   :  { %269 = dma.done.wait [#allocation3], 512  }
  0x25   :  { %270 = vsyncadd [#allocation3], 4294966784 }
  0x26   :  { %271 = dma.done.wait [#allocation6], 512  }
  0x27   :  { %272 = vsyncadd [#allocation6], 4294966784  ;;  %v199_v0 = vld [vmem:[#allocation5] sm:$0xff]   ;;  %v200_v1 = vld [vmem:[#allocation5 + $0x8] sm:$0xff]   ;;  %vm89_vm0 = vcmask 523264   ;;  %s281_s13 = smov [#allocation7]  }
  0x28   :  { %180 = vmatprep.subr.bf16.mxu0 %v199_v0  ;;  %v201_v2 = vld [vmem:[#allocation5 + $0x10] sm:$0xff]   ;;  %v44_v3 = vld [vmem:[#allocation2] sm:$0xff]  ;;  %v45_v4 = vld [vmem:[#allocation2 + $0x8] sm:$0xff]  ;;  %s154_s14 = sshll.u32 %s281_s13, 4  ;;  %s155_s14 = int_to_ptr.vmem [resolvable:$true] %s154_s14 }
  0x29   :  { %181 = vmatpush3.bf16.msra.mxu0 %v199_v0  ;;  %v48_v5 = vpack.c.bf16 %v45_v4, %v44_v3  ;;  %v202_v6 = vld [vmem:[#allocation5 + $0x18] sm:$0xff]   ;;  %v46_v7 = vld [vmem:[#allocation2 + $0x10] sm:$0xff]  ;;  %v167_v10 = vld [vmem:[%s349_s2] ss:$0 sm:$0xff]  ;;  %s247_s15 = scalar_lea.vmem %s155_s14, 512  ;;  %p252_p3 = scmp.lt.s32.totalorder %s155_s14, %s155_s14 }
  0x2a   :  { %182 = vmatprep.subr.bf16.mxu0 %v200_v1  ;;  %v47_v8 = vld [vmem:[#allocation2 + $0x18] sm:$0xff]  ;;  %p248_p2 = scmp.ne.s32.totalorder %s155_s14, %s247_s15  ;;  %p253_p4 = scmp.lt.s32.totalorder %s247_s15, %s247_s15 }
  0x2b   :  { %188 = vmatprep.mubr.msk.bf16.mxu0 %vm89_vm0, %v48_v5  ;;  %v49_v9 = vpack.c.bf16 %v47_v8, %v46_v7 }
  0x2c   :  { %p254_p5 = por %p253_p4, %p252_p3 }
  0x2d   :  { %183 = vmatpush3.bf16.msra.mxu0 %v200_v1 }
  0x2e   :  { %184 = vmatprep.subr.bf16.mxu0 %v201_v2  ;;  %p255_p6 = pnand %p254_p5, %p248_p2 }
  0x31   :  { %185 = vmatpush3.bf16.msra.mxu0 %v201_v2 }
  0x32   :  { %186 = vmatprep.subr.bf16.mxu0 %v202_v6 }
  0x35   :  { %187 = vmatpush3.bf16.msra.mxu0 %v202_v6 }
  0x38   :  { %189 = vmatmul.mubr.msk.bf16.vlgmr.msra.gmra.mrb[0].mxu0 %vm89_vm0, %v49_v9 }
 0x10b   :  { %v190_v11 = vpop.f32.mrb[0].mxu0 }
 0x10c   :  { %v139_v12 = vadd.f32 %v190_v11, %v167_v10  ;;  %v130_v13 = vpop.f32.mrb[1].mxu0 }
 0x10d   :  { %v131_v14 = vadd.f32 %v167_v10, %v130_v13  ;;  %v191_v15 = vpop.f32.mrb[2].mxu0 }
 0x10e   :  { %147 = vst [vmem:[#allocation7 + $0x10] sm:$0xff] %v139_v12  ;;  %v142_v16 = vadd.f32 %v191_v15, %v167_v10  ;;  %v133_v17 = vpop.f32.mrb[3].mxu0 }
 0x10f   :  { %145 = vst [vmem:[#allocation7] sm:$0xff] %v131_v14  ;;  %v134_v18 = vadd.f32 %v167_v10, %v133_v17 }
 0x110   :  { %148 = vst [vmem:[#allocation7 + $0x18] sm:$0xff] %v142_v16 }
 0x111   :  { %146 = vst [vmem:[#allocation7 + $0x8] sm:$0xff] %v134_v18 }
 0x112   :  { %258 = shalt.err (!%p255_p6)
}
 0x113   :  { %s259_s17 = scalar_lea.hbm %s350_s3, 512 }
 0x114   :  { %p260_p7 = scmp.ne.s32.totalorder %s350_s3, %s259_s17  ;;  %p263_p8 = scmp.lt.u32.totalorder %s259_s17, %s350_s3 }
 0x116   :  { %p265_p9 = pnand %p263_p8, %p260_p7 }
 0x118   :  { %268 = shalt.err (!%p265_p9)
}
 0x119   :  { %160 = dma.vmem_to_hbm [thread:$0]  %s155_s14, 512, %s350_s3, [#allocation4], %s276_s22, %s276_s22, %s277_s23  }
 0x11a   :  { %273 = dma.done.wait [#allocation4], 512  }
 0x11b   :  { %274 = vsyncadd [#allocation4], 4294966784 }
 0x11c   :  { %164 = vsyncpa [#allocation3], 1 }
 0x11d   :  { %165 = vsyncpa [#allocation6], 1 }
 0x11e   :  { %166 = vsyncpa [#allocation4], 1 }

</bundles_post_ra>
